<compile_context>
chip_gen: v5e
topology: v5e:2x2
jax: 0.10.0
libtpu: 0.0.40
codegen_flags: <defaults>
</compile_context>

<pallas_src>
import functools
import math

import jax
import jax.numpy as jnp
from jax.experimental import pallas as pl
from jax.experimental.pallas import tpu as pltpu


# --------------------------------------------------------------------------
# Pallas GEMM kernel: out = act(A @ B + bias)
# --------------------------------------------------------------------------
def _round_up(x, m):
    return (x + m - 1) // m * m


def _apply_act(y, act, neg_slope=0.1):
    if act is None:
        return y
    if act == "relu":
        return jnp.maximum(y, 0.0)
    if act == "relu6":
        return jnp.clip(y, 0.0, 6.0)
    if act == "elu":
        return jnp.where(y > 0, y, jnp.exp(jnp.minimum(y, 0.0)) - 1.0)
    if act == "lrelu":
        return jnp.where(y > 0, y, neg_slope * y)
    if act == "sigmoid":
        return jax.nn.sigmoid(y)
    if act == "tanh":
        return jnp.tanh(y)
    raise ValueError(act)


def _gemm_kernel(a_ref, b_ref, bias_ref, o_ref, *, act, neg_slope):
    # bf16 operands, f32 accumulation on the MXU; epilogue (bias + act) in f32.
    y = jnp.dot(a_ref[...], b_ref[...], preferred_element_type=jnp.float32)
    y = y + bias_ref[...]
    o_ref[...] = _apply_act(y, act, neg_slope).astype(o_ref.dtype)


@functools.partial(jax.jit, static_argnames=("act", "neg_slope", "out_dtype"))
def _gemm_call(a, b, bias, act, neg_slope, out_dtype):
    """act(a @ b + bias). a:(M,K) b:(K,N) bias:(N,). Full-K resident blocks
    (K = kh*kw*Cin for UpBlock convs, small enough to sit in VMEM)."""
    M, K = a.shape
    N = b.shape[1]

    # Lane-dense output tile: 128, or 256 when that costs no extra padding.
    Np = _round_up(N, 128)
    tn = 256 if (Np >= 256 and Np % 256 == 0) else 128

    # M tiling: prefer >=2 parallel blocks once M is big enough (megacore),
    # while amortizing per-grid-step overhead with larger tiles for big M.
    if M < 512:
        tm = _round_up(M, 8)
    elif M < 2048:
        tm = 256
    else:
        tm = 512
    Mp = _round_up(M, tm)

    a_bf = a.astype(jnp.bfloat16)
    if Mp != M:
        a_bf = jnp.pad(a_bf, ((0, Mp - M), (0, 0)))          # small M pad only
    b_bf = b.astype(jnp.bfloat16)
    if Np != N:
        b_bf = jnp.pad(b_bf, ((0, 0), (0, Np - N)))          # tiny weight pad
    bias_p = jnp.pad(bias.astype(jnp.float32), (0, Np - N)).reshape(1, Np)

    kernel = functools.partial(_gemm_kernel, act=act, neg_slope=neg_slope)
    out = pl.pallas_call(
        kernel,
        out_shape=jax.ShapeDtypeStruct((Mp, Np), out_dtype),
        grid_spec=pltpu.PrefetchScalarGridSpec(
            num_scalar_prefetch=0,
            grid=(Mp // tm, Np // tn),
            in_specs=[
                pl.BlockSpec((tm, K), lambda i, j: (i, 0)),   # full-K A block
                pl.BlockSpec((K, tn), lambda i, j: (0, j)),   # full-K B block
                pl.BlockSpec((1, tn), lambda i, j: (0, j)),   # bias row
            ],
            out_specs=pl.BlockSpec((tm, tn), lambda i, j: (i, j)),
        ),
        compiler_params=pltpu.CompilerParams(
            dimension_semantics=("parallel", "parallel")),
    )(a_bf, b_bf, bias_p)

    if Mp != M or Np != N:
        out = out[:M, :N]
    return out


# --------------------------------------------------------------------------
# NHWC building blocks (all conv compute goes through the Pallas GEMM)
# --------------------------------------------------------------------------
def conv2d_nhwc(x, w, b, stride=1, padding=0, dilation=1, act=None, neg=0.1,
                out_dtype=jnp.float32):
    """x: (N,H,W,Cin) NHWC; w: (Cout,Cin,kh,kw) torch layout; b: (Cout,)|None."""
    N, H, W, Cin = x.shape
    Cout, _, kh, kw = w.shape
    x = x.astype(jnp.bfloat16)                 # bf16 im2col buffer (half traffic)
    if padding > 0:
        x = jnp.pad(x, ((0, 0), (padding, padding), (padding, padding), (0, 0)))
    Hp, Wp = x.shape[1], x.shape[2]
    Ho = (Hp - dilation * (kh - 1) - 1) // stride + 1
    Wo = (Wp - dilation * (kw - 1) - 1) // stride + 1

    if kh == 1 and kw == 1 and stride == 1:
        col = x.reshape(N * Ho * Wo, Cin)
    else:
        taps = []
        for i in range(kh):
            for j in range(kw):
                taps.append(
                    x[:, i * dilation: i * dilation + stride * (Ho - 1) + 1: stride,
                         j * dilation: j * dilation + stride * (Wo - 1) + 1: stride, :])
        col = jnp.concatenate(taps, axis=-1).reshape(N * Ho * Wo, kh * kw * Cin)

    # column order is (tap_i, tap_j, ci)  ->  reorder weight to match
    wm = w.transpose(2, 3, 1, 0).reshape(kh * kw * Cin, Cout)
    bias = jnp.zeros((Cout,), jnp.float32) if b is None else b
    y = _gemm_call(col, wm, bias, act, neg, out_dtype)
    return y.reshape(N, Ho, Wo, Cout)


def conv_transpose_3x3_s2_nhwc(x, w, b, out_dtype=jnp.bfloat16):
    """ConvTranspose2d(k=3, stride=2, padding=1, output_padding=1), NHWC.
    Decomposed into 4 output-parity GEMMs (no zero-stuffed input).
    w: torch layout (Cin, Cout, 3, 3)."""
    # TODO(synk): only kernel_size=3 supported (the configuration UpBlock/ERRNet use).
    N, H, W, Cin = x.shape
    Cout = w.shape[1]
    x = x.astype(jnp.bfloat16)
    xz = jnp.pad(x, ((0, 0), (0, 1), (0, 1), (0, 0)))       # zero pad bottom/right
    x00 = xz[:, :H, :W, :]
    x01 = xz[:, :H, 1:W + 1, :]
    x10 = xz[:, 1:H + 1, :W, :]
    x11 = xz[:, 1:H + 1, 1:W + 1, :]

    def sub_gemm(parts, taps):
        a = jnp.concatenate(parts, axis=-1).reshape(N * H * W, len(parts) * Cin)
        wm = jnp.concatenate([w[:, :, u, v] for (u, v) in taps], axis=0)
        y = _gemm_call(a, wm, b, None, 0.1, out_dtype)
        return y.reshape(N, H, W, Cout)

    ee = sub_gemm([x00], [(1, 1)])                                   # out[2a,   2b]
    eo = sub_gemm([x00, x01], [(1, 2), (1, 0)])                      # out[2a,   2b+1]
    oe = sub_gemm([x00, x10], [(2, 1), (0, 1)])                      # out[2a+1, 2b]
    oo = sub_gemm([x00, x01, x10, x11],
                  [(2, 2), (2, 0), (0, 2), (0, 0)])                  # out[2a+1, 2b+1]

    top = jnp.stack([ee, eo], axis=3)        # (N,H,W,2,C)
    bot = jnp.stack([oe, oo], axis=3)
    out = jnp.stack([top, bot], axis=2)      # (N,H,2,W,2,C)
    return out.reshape(N, 2 * H, 2 * W, Cout)


def upsample_bilinear_2x_nhwc(x):
    """nn.Upsample(scale_factor=2, mode='bilinear', align_corners=True)."""
    N, H, W, C = x.shape

    def interp_matrix(n_in, n_out):
        if n_in == 1:
            return jnp.ones((n_out, 1), jnp.float32)
        pos = jnp.arange(n_out, dtype=jnp.float32) * (n_in - 1) / (n_out - 1)
        lo = jnp.clip(jnp.floor(pos).astype(jnp.int32), 0, n_in - 2)
        frac = pos - lo.astype(jnp.float32)
        m = jnp.zeros((n_out, n_in), jnp.float32)
        m = m.at[jnp.arange(n_out), lo].add(1.0 - frac)
        m = m.at[jnp.arange(n_out), lo + 1].add(frac)
        return m

    Mh = interp_matrix(H, 2 * H)
    Mw = interp_matrix(W, 2 * W)
    y = jnp.einsum("oh,nhwc->nowc", Mh, x)
    y = jnp.einsum("pw,nowc->nopc", Mw, y)
    return y


def replicate_pad_to_nhwc(x, h2, w2):
    """pad() from the torch code: replicate-pad right/bottom to (h2, w2)."""
    h1, w1 = x.shape[1], x.shape[2]
    if h1 == h2 and w1 == w2:
        return x
    return jnp.pad(x, ((0, 0), (0, h2 - h1), (0, w2 - w1), (0, 0)), mode="edge")


# --------------------------------------------------------------------------
# UpBlock parameters + forward (module I/O in NCHW, matching PyTorch)
# --------------------------------------------------------------------------
def _init_conv(key, cin, cout, k):
    kw_key, kb_key = jax.random.split(key)
    fan = cin * k * k
    w = jax.random.normal(kw_key, (cout, cin, k, k), jnp.float32) / math.sqrt(fan)
    b = 0.01 * jax.random.normal(kb_key, (cout,), jnp.float32)
    return {"w": w, "b": b, "k": k}


def _init_conv_transpose(key, cin, cout, k):
    kw_key, kb_key = jax.random.split(key)
    fan = cin * k * k
    w = jax.random.normal(kw_key, (cin, cout, k, k), jnp.float32) / math.sqrt(fan)
    b = 0.01 * jax.random.normal(kb_key, (cout,), jnp.float32)
    return {"w": w, "b": b, "k": k}


def init_upblock(key, in_channels, out_channels, mid_channels=None,
                 add_channels=None, kernels=None, bilinear=False):
    assert isinstance(kernels, (list, tuple))
    if mid_channels is None:
        mid_channels = out_channels
    if isinstance(mid_channels, int):
        i_channels = [in_channels] + [mid_channels] * (len(kernels) - 1)
        o_channels = [mid_channels] * (len(kernels) - 1) + [out_channels]
    else:
        assert len(mid_channels) == len(kernels) - 1
        i_channels = [in_channels] + list(mid_channels)
        o_channels = list(mid_channels) + [out_channels]

    keys = jax.random.split(key, len(kernels) + 1)
    params = {"bilinear": bool(bilinear), "convs": []}
    if bilinear:
        if add_channels is not None:
            i_channels[0] += add_channels
        for i, k in enumerate(kernels):
            params["convs"].append(_init_conv(keys[i], i_channels[i], o_channels[i], k))
    else:
        assert kernels[0] == 3, "ConvTranspose branch implemented for kernel=3"
        params["up"] = _init_conv_transpose(keys[0], i_channels[0], o_channels[0], kernels[0])
        if add_channels is not None:
            i_channels[1] += add_channels
        for i in range(1, len(kernels)):
            params["convs"].append(_init_conv(keys[i], i_channels[i], o_channels[i], kernels[i]))
    return params


@functools.partial(jax.jit, static_argnames=("bilinear", "kernels", "shape"))
def _upblock_forward_impl(x_nchw, feat_nchw, up_w, up_b, conv_ws, conv_bs, *,
                          bilinear, kernels, shape):
    x = jnp.transpose(x_nchw, (0, 2, 3, 1))                     # -> NHWC
    feat = None if feat_nchw is None else jnp.transpose(feat_nchw, (0, 2, 3, 1))

    if bilinear:
        up = upsample_bilinear_2x_nhwc(x)
    else:
        up = conv_transpose_3x3_s2_nhwc(x, up_w, up_b, out_dtype=jnp.bfloat16)

    if feat is not None:
        h2, w2 = feat.shape[1], feat.shape[2]
    else:
        h2, w2 = shape
    up = replicate_pad_to_nhwc(up, h2, w2)

    # Keep the concat buffer in bf16 (it is re-cast to bf16 for the GEMM anyway).
    up = up.astype(jnp.bfloat16)
    if feat is None:
        h = up
    else:
        h = jnp.concatenate([up, feat.astype(jnp.bfloat16)], axis=-1)

    # UpBlock's ConvNormAct layers: norm=None, act='relu', bias=True, pad=k//2.
    # Intermediate layers emit bf16; only the last emits f32 (module output).
    n_convs = len(conv_ws)
    for li in range(n_convs):
        k = kernels[li]
        out_dt = jnp.float32 if li == n_convs - 1 else jnp.bfloat16
        h = conv2d_nhwc(h, conv_ws[li], conv_bs[li], stride=1, padding=k // 2,
                        dilation=1, act="relu", out_dtype=out_dt)
    return jnp.transpose(h, (0, 3, 1, 2))                       # -> NCHW


def upblock_forward(x_nchw, params, feat_nchw=None, shape=None):
    assert feat_nchw is not None or shape is not None
    bilinear = bool(params["bilinear"])
    conv_ws = tuple(cp["w"] for cp in params["convs"])
    conv_bs = tuple(cp["b"] for cp in params["convs"])
    # Static kernel sizes for the conv layers after the upsample step.
    ks = tuple(int(cp["k"]) for cp in params["convs"])
    up_w = None if bilinear else params["up"]["w"]
    up_b = None if bilinear else params["up"]["b"]
    shape_t = None if shape is None else (int(shape[0]), int(shape[1]))
    return _upblock_forward_impl(x_nchw, feat_nchw, up_w, up_b, conv_ws, conv_bs,
                                 bilinear=bilinear, kernels=ks, shape=shape_t)


# --------------------------------------------------------------------------
if __name__ == "__main__":
    key = jax.random.PRNGKey(0)
    kx, kf, kp1, kp2 = jax.random.split(key, 4)

    # Small shapes: batch=2, in/skip/out channels=8, spatial 8 -> upsampled 16
    B, Cin, Cskip, Cout, H, W = 2, 8, 8, 8, 8, 8
    x = jax.random.normal(kx, (B, Cin, H, W), jnp.float32)
    feat = jax.random.normal(kf, (B, Cskip, 2 * H, 2 * W), jnp.float32)

    # Bilinear branch (ERRNet-style usage: bilinear 2x up, concat skip, convs)
    p_bil = init_upblock(kp1, Cin, Cout, add_channels=Cskip,
                         kernels=[3, 3], bilinear=True)
    y_bil = upblock_forward(x, p_bil, feat_nchw=feat)

    # Transposed-conv branch (bilinear=False)
    p_tr = init_upblock(kp2, Cin, Cout, add_channels=Cskip,
                        kernels=[3, 3], bilinear=False)
    y_tr = upblock_forward(x, p_tr, feat_nchw=feat)

    y_bil, y_tr = jax.block_until_ready((y_bil, y_tr))

    assert y_bil.shape == (B, Cout, 2 * H, 2 * W)
    assert y_tr.shape == (B, Cout, 2 * H, 2 * W)
    assert y_bil.dtype == jnp.float32 and y_tr.dtype == jnp.float32
    assert bool(jnp.all(jnp.isfinite(y_bil)))
    assert bool(jnp.all(jnp.isfinite(y_tr)))
    print("KERNEL_OK")
</pallas_src>

<mosaic_0001>
module attributes {stable_mosaic.version = 11 : i64} {
  func.func @_gemm_kernel(%arg0: i32, %arg1: i32, %arg2: memref<256x144xbf16, #tpu.memory_space<vmem>>, %arg3: memref<144x128xbf16, #tpu.memory_space<vmem>>, %arg4: memref<1x128xf32, #tpu.memory_space<vmem>>, %arg5: memref<256x128xbf16, #tpu.memory_space<vmem>>) attributes {dimension_semantics = [#tpu.dimension_semantics<parallel>, #tpu.dimension_semantics<parallel>], iteration_bounds = array<i64: 2, 1>, scalar_prefetch = 0 : i64, scratch_operands = 0 : i64, tpu.core_type = #tpu.core_type<tc>, window_params = [{transform_indices = @transform_0, window_bounds = array<i64: 256, 144>}, {transform_indices = @transform_1, window_bounds = array<i64: 144, 128>}, {transform_indices = @transform_2, window_bounds = array<i64: 1, 128>}, {transform_indices = @transform_3, window_bounds = array<i64: 256, 128>}]} {
    %c0 = arith.constant 0 : index
    %c0_0 = arith.constant 0 : index
    %0 = vector.load %arg2[%c0, %c0_0] : memref<256x144xbf16, #tpu.memory_space<vmem>>, vector<256x144xbf16>
    %c0_1 = arith.constant 0 : index
    %c0_2 = arith.constant 0 : index
    %1 = vector.load %arg3[%c0_1, %c0_2] : memref<144x128xbf16, #tpu.memory_space<vmem>>, vector<144x128xbf16>
    %cst = arith.constant dense<0.000000e+00> : vector<256x128xf32>
    %2 = tpu.matmul %0, %1, %cst {dimension_numbers = #tpu.dot_dimension_numbers<[1], [0], [0], [1], [0, 0, 1, 1], [], []>} : vector<256x144xbf16>, vector<144x128xbf16>, vector<256x128xf32> -> vector<256x128xf32>
    %c0_3 = arith.constant 0 : index
    %c0_4 = arith.constant 0 : index
    %3 = vector.load %arg4[%c0_3, %c0_4] : memref<1x128xf32, #tpu.memory_space<vmem>>, vector<1x128xf32>
    %4 = vector.broadcast %3 : vector<1x128xf32> to vector<256x128xf32>
    %5 = arith.addf %2, %4 : vector<256x128xf32>
    %cst_5 = arith.constant 0.000000e+00 : f32
    %6 = vector.broadcast %cst_5 : f32 to vector<256x128xf32>
    %7 = arith.maximumf %5, %6 : vector<256x128xf32>
    %8 = arith.truncf %7 : vector<256x128xf32> to vector<256x128xbf16>
    %c0_6 = arith.constant 0 : index
    %c0_7 = arith.constant 0 : index
    %9 = vector.load %arg5[%c0_6, %c0_7] : memref<256x128xbf16, #tpu.memory_space<vmem>>, vector<256x128xbf16>
    tpu.vector_store %arg5[%c0_6, %c0_7], %8 {strides = array<i32>} : memref<256x128xbf16, #tpu.memory_space<vmem>>, vector<256x128xbf16>,
    return
  }
  func.func @transform_0(%arg0: i32, %arg1: i32) -> (i32, i32) {
    %c0_i32 = arith.constant 0 : i32
    %c0_i32_0 = arith.constant 0 : i32
    return %arg0, %c0_i32 : i32, i32
  }
  func.func @transform_1(%arg0: i32, %arg1: i32) -> (i32, i32) {
    %c0_i32 = arith.constant 0 : i32
    %c0_i32_0 = arith.constant 0 : i32
    return %c0_i32, %arg1 : i32, i32
  }
  func.func @transform_2(%arg0: i32, %arg1: i32) -> (i32, i32) {
    %c0_i32 = arith.constant 0 : i32
    %c0_i32_0 = arith.constant 0 : i32
    return %c0_i32, %arg1 : i32, i32
  }
  func.func @transform_3(%arg0: i32, %arg1: i32) -> (i32, i32) {
    %c0_i32 = arith.constant 0 : i32
    return %arg0, %arg1 : i32, i32
  }
}

</mosaic_0001>

<bundles_post_ra>
// kernel: _gemm_call.1
= control target key start
LH: loop header
LB: loop body
LE: loop exit
PB: predicated region body
PF: predicated region fallthrough
CT: control target
= control target key end

     0   :  { %s1315_s12 = smov 0   ;;  %s1317_s13 = smov 0   ;;  %s1522_s0 = inlined_call_operand.vmem [shape: bf16[512,144], index: 0, kind: input, shape index: {}]   ;;  %s1523_s1 = inlined_call_operand.vmem [shape: bf16[144,128], index: 1, kind: input, shape index: {}]   ;;  %s1524_s2 = inlined_call_operand.vmem [shape: f32[1,128], index: 2, kind: input, shape index: {}]   ;;  %s1525_s3 = inlined_call_operand.vmem [shape: bf16[512,128], index: 3, kind: output, shape index: {}]  }
   0x1   :  { %s1319_s14 = smov 0  }
   0x2 LB: > { %s25_s15 = sadd.s32 1, %s1289_s13  ;;  %p912_p0 = scmp.ge.s32.totalorder %s1293_s14, 1  ;;  %s1293_s14 = sphi %s1319_s14, %s13_s14   ;;  %s1289_s13 = sphi %s1317_s13, %s1527_s13   ;;  %s1285_s12 = sphi %s1315_s12, %s1526_s12  }
   0x3   : > { %p27_p1 = scmp.ge.s32.totalorder %s25_s15, 2  ;;  %p170_p2 = scmp.lt.s32.totalorder %s1293_s14, 3 }
   0x5   : > { %s1529_s15 = smov (%p27_p1, %s25_s15), 0  ;;  %p171_p3 = pnand %p912_p0, %p170_p2 }
   0x6   : > { %s913_s20 = sshll.u32 (!%p171_p3), %s1285_s12, 5 }
   0x7   : > { %174 = sbr.rel (%p171_p3) target bundleno = 305 (0x131), region = 32  ;;  %p206_p4 = scmp.lt.s32.totalorder (!%p171_p3), %s913_s20, 63 }
   0xc   : > { %v1140_v0 = vld [vmem:[%s1523_s1 + $0x38] sm:$0xff]  ;;  %v1141_v1 = vld [vmem:[%s1523_s1 + $0x40] sm:$0xff]  ;;  %v1139_v2 = vld [vmem:[%s1523_s1 + $0x30] sm:$0xff]  ;;  %s1531_s20 = smov (!%p206_p4, %s913_s20), 63  ;;  %vm481_vm0 = vcmask 130048  }
   0xd   : > { %530 = vmatpush.bf16.msra.mxu0 %v1140_v0  ;;  %1237 = vmatpush.bf16.msra.mxu2 %v1140_v0  ;;  %s1100_s23 = sshll.u32 %s1531_s20, 3  ;;  %v1138_v3 = vld [vmem:[%s1523_s1 + $0x28] sm:$0xff]  ;;  %v1137_v7 = vld [vmem:[%s1523_s1 + $0x20] sm:$0xff]  ;;  %v1136_v11 = vld [vmem:[%s1523_s1 + $0x18] sm:$0xff]  ;;  %s917_s17 = sshll.u32 %s1531_s20, 2 }
   0xe   : > { %626 = vmatpush.bf16.msra.mxu1 %v1141_v1  ;;  %1245 = vmatpush.bf16.msra.mxu3 %v1141_v1  ;;  %s1348_s26 = scalar_lea.vmem %s1522_s0, %s1100_s23  ;;  %v1135_v12 = vld [vmem:[%s1523_s1 + $0x10] sm:$0xff]  ;;  %v1134_v16 = vld [vmem:[%s1523_s1 + $0x8] sm:$0xff]  ;;  %v1133_v19 = vld [vmem:[%s1523_s1] sm:$0xff]  ;;  %s1461_s21 = scalar_lea.vmem %s1525_s3, %s917_s17 }
   0xf   : > { %v1101_v4 = vld [vmem:[%s1348_s26 + $0x4] sm:$0xf]  ;;  %v922_v5 = vld [vmem:[%s1348_s26 + $0x8] sm:$0xf0]  ;;  %v1119_v8 = vld [vmem:[%s1348_s26 + $0x94] sm:$0xf] }
  0x10   : > { %v925_v6 = vor.u32 %v1101_v4, %v922_v5  ;;  %v994_v9 = vld [vmem:[%s1348_s26 + $0x98] sm:$0xf0]  ;;  %v1103_v13 = vld [vmem:[%s1348_s26 + $0x14] sm:$0xf]  ;;  %v1121_v17 = vld [vmem:[%s1348_s26 + $0xa4] sm:$0xf] }
  0x11   : > { %531 = vmatpush.bf16.msra.mxu0 %v1139_v2  ;;  %1238 = vmatpush.bf16.msra.mxu2 %v1139_v2  ;;  %v997_v10 = vor.u32 %v1119_v8, %v994_v9  ;;  %v930_v14 = vld [vmem:[%s1348_s26 + $0x18] sm:$0xf0]  ;;  %v1002_v18 = vld [vmem:[%s1348_s26 + $0xa8] sm:$0xf0]  ;;  %v920_v20 = vld [vmem:[%s1348_s26] sm:$0xf] }
  0x12   : > { %1082 = vmatmul.msk.bf16.vlgmr.msra.gmra.mxu1 %vm481_vm0, %v925_v6  ;;  %v933_v15 = vor.u32 %v1103_v13, %v930_v14  ;;  %v1102_v21 = vld [vmem:[%s1348_s26 + $0x4] sm:$0xf0]  ;;  %v1005_v22 = vor.u32 %v1121_v17, %v1002_v18  ;;  %v984_v23 = vld [vmem:[%s1348_s26 + $0x80] sm:$0xf]  ;;  %v1105_v27 = vld [vmem:[%s1348_s26 + $0x24] sm:$0xf] }
  0x13   : > { %1091 = vmatmul.msk.bf16.vlgmr.msra.gmra.mxu3 %vm481_vm0, %v997_v10  ;;  %v1118_v24 = vld [vmem:[%s1348_s26 + $0x84] sm:$0xf0]  ;;  %v921_v25 = vor.u32 %v1102_v21, %v920_v20  ;;  %v938_v28 = vld [vmem:[%s1348_s26 + $0x28] sm:$0xf0]  ;;  %v1123_v30 = vld [vmem:[%s1348_s26 + $0xb4] sm:$0xf] }
  0x14   : > { %v985_v26 = vor.u32 %v1118_v24, %v984_v23  ;;  %v941_v29 = vor.u32 %v1105_v27, %v938_v28  ;;  %v1010_v31 = vld [vmem:[%s1348_s26 + $0xb8] sm:$0xf0]  ;;  %v928_v32 = vld [vmem:[%s1348_s26 + $0x10] sm:$0xf]  ;;  %v1104_v33 = vld [vmem:[%s1348_s26 + $0x14] sm:$0xf0] }
  0x15   : > { %532 = vmatpush.bf16.msra.mxu0 %v1138_v3  ;;  %1239 = vmatpush.bf16.msra.mxu2 %v1138_v3  ;;  %v1013_v34 = vor.u32 %v1123_v30, %v1010_v31  ;;  %v992_v35 = vld [vmem:[%s1348_s26 + $0x90] sm:$0xf]  ;;  %v1120_v36 = vld [vmem:[%s1348_s26 + $0x94] sm:$0xf0]  ;;  %v929_v37 = vor.u32 %v1104_v33, %v928_v32  ;;  %v1107_v39 = vld [vmem:[%s1348_s26 + $0x34] sm:$0xf] }
  0x16   : > { %v993_v38 = vor.u32 %v1120_v36, %v992_v35  ;;  %v946_v40 = vld [vmem:[%s1348_s26 + $0x38] sm:$0xf0]  ;;  %v1125_v42 = vld [vmem:[%s1348_s26 + $0xc4] sm:$0xf]  ;;  %v1018_v43 = vld [vmem:[%s1348_s26 + $0xc8] sm:$0xf0] }
  0x17   : > { %v949_v41 = vor.u32 %v1107_v39, %v946_v40  ;;  %v936_v44 = vld [vmem:[%s1348_s26 + $0x20] sm:$0xf]  ;;  %v1106_v45 = vld [vmem:[%s1348_s26 + $0x24] sm:$0xf0]  ;;  %v1021_v46 = vor.u32 %v1125_v42, %v1018_v43  ;;  %v1109_v51 = vld [vmem:[%s1348_s26 + $0x44] sm:$0xf] }
  0x18   : > { %v1000_v47 = vld [vmem:[%s1348_s26 + $0xa0] sm:$0xf]  ;;  %v1122_v48 = vld [vmem:[%s1348_s26 + $0xa4] sm:$0xf0]  ;;  %v937_v49 = vor.u32 %v1106_v45, %v936_v44  ;;  %v954_v52 = vld [vmem:[%s1348_s26 + $0x48] sm:$0xf0] }
  0x19   : > { %533 = vmatpush.bf16.msra.mxu0 %v1137_v7  ;;  %1240 = vmatpush.bf16.msra.mxu2 %v1137_v7  ;;  %v1001_v50 = vor.u32 %v1122_v48, %v1000_v47  ;;  %v957_v53 = vor.u32 %v1109_v51, %v954_v52  ;;  %v1127_v54 = vld [vmem:[%s1348_s26 + $0xd4] sm:$0xf]  ;;  %v1026_v55 = vld [vmem:[%s1348_s26 + $0xd8] sm:$0xf0]  ;;  %v944_v56 = vld [vmem:[%s1348_s26 + $0x30] sm:$0xf] }
  0x1a   : > { %v1108_v57 = vld [vmem:[%s1348_s26 + $0x34] sm:$0xf0]  ;;  %v1029_v58 = vor.u32 %v1127_v54, %v1026_v55  ;;  %v1008_v59 = vld [vmem:[%s1348_s26 + $0xb0] sm:$0xf]  ;;  %v1111_v63 = vld [vmem:[%s1348_s26 + $0x54] sm:$0xf] }
  0x1b   : > { %v1124_v60 = vld [vmem:[%s1348_s26 + $0xb4] sm:$0xf0]  ;;  %v945_v61 = vor.u32 %v1108_v57, %v944_v56  ;;  %v962_v0 = vld [vmem:[%s1348_s26 + $0x58] sm:$0xf0]  ;;  %v1129_v2 = vld [vmem:[%s1348_s26 + $0xe4] sm:$0xf] }
  0x1c   : > { %v1009_v62 = vor.u32 %v1124_v60, %v1008_v59  ;;  %v965_v1 = vor.u32 %v1111_v63, %v962_v0  ;;  %v1034_v3 = vld [vmem:[%s1348_s26 + $0xe8] sm:$0xf0]  ;;  %v952_v4 = vld [vmem:[%s1348_s26 + $0x40] sm:$0xf]  ;;  %v1110_v5 = vld [vmem:[%s1348_s26 + $0x44] sm:$0xf0] }
  0x1d   : > { %534 = vmatpush.bf16.msra.mxu0 %v1136_v11  ;;  %1241 = vmatpush.bf16.msra.mxu2 %v1136_v11  ;;  %v1037_v6 = vor.u32 %v1129_v2, %v1034_v3  ;;  %v1016_v7 = vld [vmem:[%s1348_s26 + $0xc0] sm:$0xf]  ;;  %v1126_v8 = vld [vmem:[%s1348_s26 + $0xc4] sm:$0xf0]  ;;  %v953_v9 = vor.u32 %v1110_v5, %v952_v4  ;;  %v1113_v11 = vld [vmem:[%s1348_s26 + $0x64] sm:$0xf] }
  0x1e   : > { %v1017_v10 = vor.u32 %v1126_v8, %v1016_v7  ;;  %v1131_v14 = vld [vmem:[%s1348_s26 + $0xf4] sm:$0xf]  ;;  %v1112_v17 = vld [vmem:[%s1348_s26 + $0x54] sm:$0xf0]  ;;  %v978_v24 = vld [vmem:[%s1348_s26 + $0x78] sm:$0xf0] }
  0x1f   : > { %v1128_v20 = vld [vmem:[%s1348_s26 + $0xd4] sm:$0xf0]  ;;  %v1115_v23 = vld [vmem:[%s1348_s26 + $0x74] sm:$0xf]  ;;  %v1114_v27 = vld [vmem:[%s1348_s26 + $0x64] sm:$0xf0] }
  0x20   : > { %v1032_v28 = vld [vmem:[%s1348_s26 + $0xe0] sm:$0xf]  ;;  %v1117_v32 = vld [vmem:[%s1348_s26 + $0x84] sm:$0xf]  ;;  %v986_v33 = vld [vmem:[%s1348_s26 + $0x88] sm:$0xf0] }
  0x21   : > { %535 = vmatpush.bf16.msra.mxu0 %v1135_v12  ;;  %1242 = vmatpush.bf16.msra.mxu2 %v1135_v12  ;;  %v970_v12 = vld [vmem:[%s1348_s26 + $0x68] sm:$0xf0]  ;;  %v976_v36 = vld [vmem:[%s1348_s26 + $0x70] sm:$0xf]  ;;  %v1132_v39 = vld [vmem:[%s1348_s26 + $0xf4] sm:$0xf0] }
  0x22   : > { %1083 = vmatmul.msk.bf16.gmra.mxu1 %vm481_vm0, %v933_v15  ;;  %v973_v13 = vor.u32 %v1113_v11, %v970_v12  ;;  %v1042_v15 = vld [vmem:[%s1348_s26 + $0xf8] sm:$0xf0] }
  0x23   : > { %1092 = vmatmul.msk.bf16.gmra.mxu3 %vm481_vm0, %v1005_v22  ;;  %v1045_v18 = vor.u32 %v1131_v14, %v1042_v15 }
  0x25   : > { %536 = vmatpush.bf16.msra.mxu0 %v1134_v16  ;;  %1243 = vmatpush.bf16.msra.mxu2 %v1134_v16  ;;  %v960_v16 = vld [vmem:[%s1348_s26 + $0x50] sm:$0xf] }
  0x26   : > { %v961_v21 = vor.u32 %v1112_v17, %v960_v16 }
  0x29   : > { %537 = vmatpush.bf16.msra.mxu0 %v1133_v19  ;;  %1244 = vmatpush.bf16.msra.mxu2 %v1133_v19  ;;  %v1024_v19 = vld [vmem:[%s1348_s26 + $0xd0] sm:$0xf] }
  0x2a   : > { %v1025_v22 = vor.u32 %v1128_v20, %v1024_v19 }
  0x2c   : > { %538 = vmatmul.bf16.vlgmr.msra.gmra.mxu0 %v921_v25  ;;  %578 = vmatmul.bf16.vlgmr.msra.gmra.mxu2 %v985_v26  ;;  %v981_v25 = vor.u32 %v1115_v23, %v978_v24  ;;  %v968_v26 = vld [vmem:[%s1348_s26 + $0x60] sm:$0xf] }
  0x2d   : > { %v969_v30 = vor.u32 %v1114_v27, %v968_v26 }
  0x32   : > { %1084 = vmatmul.msk.bf16.gmra.mxu1 %vm481_vm0, %v941_v29  ;;  %v1130_v29 = vld [vmem:[%s1348_s26 + $0xe4] sm:$0xf0] }
  0x33   : > { %1093 = vmatmul.msk.bf16.gmra.mxu3 %vm481_vm0, %v1013_v34  ;;  %v1033_v31 = vor.u32 %v1130_v29, %v1032_v28  ;;  %v989_v34 = vor.u32 %v1117_v32, %v986_v33 }
  0x3c   : > { %543 = vmatmul.bf16.gmra.mxu0 %v929_v37  ;;  %583 = vmatmul.bf16.gmra.mxu2 %v993_v38  ;;  %v1116_v37 = vld [vmem:[%s1348_s26 + $0x74] sm:$0xf0]  ;;  %v1040_v38 = vld [vmem:[%s1348_s26 + $0xf0] sm:$0xf] }
  0x3d   : > { %v977_v40 = vor.u32 %v1116_v37, %v976_v36 }
  0x42   : > { %1085 = vmatmul.msk.bf16.gmra.mxu1 %vm481_vm0, %v949_v41  ;;  %v1041_v41 = vor.u32 %v1132_v39, %v1040_v38 }
  0x43   : > { %1094 = vmatmul.msk.bf16.gmra.mxu3 %vm481_vm0, %v1021_v46  ;;  %v1451_v46 = vld [vmem:[%s1524_s2] ss:$0 sm:$0xff] }
  0x4c   : > { %548 = vmatmul.bf16.gmra.mxu0 %v937_v49  ;;  %588 = vmatmul.bf16.gmra.mxu2 %v1001_v50 }
  0x52   : > { %1086 = vmatmul.msk.bf16.gmra.mxu1 %vm481_vm0, %v957_v53 }
  0x53   : > { %1095 = vmatmul.msk.bf16.gmra.mxu3 %vm481_vm0, %v1029_v58 }
  0x5c   : > { %553 = vmatmul.bf16.gmra.mxu0 %v945_v61  ;;  %593 = vmatmul.bf16.gmra.mxu2 %v1009_v62 }
  0x62   : > { %1087 = vmatmul.msk.bf16.gmra.mxu1 %vm481_vm0, %v965_v1 }
  0x63   : > { %1096 = vmatmul.msk.bf16.gmra.mxu3 %vm481_vm0, %v1037_v6 }
  0x6c   : > { %558 = vmatmul.bf16.gmra.mxu0 %v953_v9  ;;  %598 = vmatmul.bf16.gmra.mxu2 %v1017_v10 }
  0x72   : > { %1088 = vmatmul.msk.bf16.gmra.mxu1 %vm481_vm0, %v973_v13 }
  0x73   : > { %1097 = vmatmul.msk.bf16.gmra.mxu3 %vm481_vm0, %v1045_v18 }
  0x7c   : > { %563 = vmatmul.bf16.gmra.mxu0 %v961_v21  ;;  %603 = vmatmul.bf16.gmra.mxu2 %v1025_v22 }
  0x82   : > { %1089 = vmatmul.msk.bf16.gmra.mxu1 %vm481_vm0, %v981_v25 }
  0x8c   : > { %568 = vmatmul.bf16.gmra.mxu0 %v969_v30  ;;  %608 = vmatmul.bf16.gmra.mxu2 %v1033_v31 }
  0x8f   : > { %v628_v35 = vpop.f32.mrf.mxu1 }
  0x92   : > { %1090 = vmatmul.msk.bf16.gmra.mxu1 %vm481_vm0, %v989_v34 }
  0x96   : > { %v673_v44 = vpop.f32.mrf.mxu3 }
  0x97   : > { %v630_v42 = vpop.f32.mrf.mxu1 }
  0x9c   : > { %573 = vmatmul.bf16.gmra.mxu0 %v977_v40  ;;  %613 = vmatmul.bf16.gmra.mxu2 %v1041_v41 }
  0x9e   : > { %v675_v54 = vpop.f32.mrf.mxu3 }
  0x9f   : > { %v633_v43 = vpop.f32.mrf.mxu1 }
  0xa6   : > { %v678_v62 = vpop.f32.mrf.mxu3 }
  0xa7   : > { %v635_v47 = vpop.f32.mrf.mxu1 }
  0xa9   : > { %v539_v45 = vpop.f32.mrf.mxu0 }
  0xaa   : > { %v540_v48 = vadd.f32 %v1451_v46, %v539_v45 }
  0xac   : > { %v629_v51 = vadd.f32 %v628_v35, %v540_v48 }
  0xae   : > { %v708_v56 = vmax.f32 %v629_v51, 0.0  ;;  %v680_v9 = vpop.f32.mrf.mxu3 }
  0xaf   : > { %v1454_v49 = vpop.f32.mrf.mxu2  ;;  %v638_v53 = vpop.f32.mrf.mxu1 }
  0xb1   : > { %v541_v50 = vpop.f32.mrf.mxu0 }
  0xb2   : > { %v542_v52 = vadd.f32 %v1451_v46, %v541_v50 }
  0xb4   : > { %v631_v55 = vadd.f32 %v630_v42, %v542_v52 }
  0xb6   : > { %v709_v57 = vmax.f32 %v631_v55, 0.0  ;;  %v683_v22 = vpop.f32.mrf.mxu3 }
  0xb7   : > { %v1463_v59 = vpop.f32.mrf.mxu2  ;;  %v640_v61 = vpop.f32.mrf.mxu1 }
  0xb8   : > { %v1145_v58 = vpack.c.bf16 %v709_v57, %v708_v56 }
  0xb9   : > { %v544_v60 = vpop.f32.mrf.mxu0 }
  0xba   : > { %1146 = vst [vmem:[%s1461_s21] sm:$0xff] %v1145_v58   ;;  %v545_v63 = vadd.f32 %v1451_v46, %v544_v60 }
  0xbc   : > { %v634_v2 = vadd.f32 %v633_v43, %v545_v63 }
  0xbe   : > { %v710_v7 = vmax.f32 %v634_v2, 0.0  ;;  %v685_v37 = vpop.f32.mrf.mxu3 }
  0xbf   : > { %v584_v0 = vpop.f32.mrf.mxu2  ;;  %v643_v4 = vpop.f32.mrf.mxu1 }
  0xc0   : > { %v585_v6 = vadd.f32 %v1451_v46, %v584_v0 }
  0xc1   : > { %v546_v1 = vpop.f32.mrf.mxu0 }
  0xc2   : > { %v547_v3 = vadd.f32 %v1451_v46, %v546_v1  ;;  %v674_v12 = vadd.f32 %v673_v44, %v585_v6 }
  0xc4   : > { %v636_v5 = vadd.f32 %v635_v47, %v547_v3  ;;  %v726_v17 = vmax.f32 %v674_v12, 0.0 }
  0xc6   : > { %v711_v8 = vmax.f32 %v636_v5, 0.0  ;;  %v688_v51 = vpop.f32.mrf.mxu3 }
  0xc7   : > { %v586_v11 = vpop.f32.mrf.mxu2  ;;  %v645_v15 = vpop.f32.mrf.mxu1 }
  0xc8   : > { %v1150_v10 = vpack.c.bf16 %v711_v8, %v710_v7  ;;  %v587_v13 = vadd.f32 %v1451_v46, %v586_v11 }
  0xc9   : > { %v549_v14 = vpop.f32.mrf.mxu0 }
  0xca   : > { %1222 = vst [vmem:[%s1461_s21 + $0x8] sm:$0xff] %v1150_v10   ;;  %v676_v16 = vadd.f32 %v675_v54, %v587_v13  ;;  %v550_v19 = vadd.f32 %v1451_v46, %v549_v14 }
  0xcc   : > { %v727_v18 = vmax.f32 %v676_v16, 0.0  ;;  %v639_v24 = vadd.f32 %v638_v53, %v550_v19 }
  0xce   : > { %v1190_v20 = vpack.c.bf16 %v727_v18, %v726_v17  ;;  %v712_v29 = vmax.f32 %v639_v24, 0.0  ;;  %v690_v2 = vpop.f32.mrf.mxu3 }
  0xcf   : > { %v589_v21 = vpop.f32.mrf.mxu2  ;;  %v648_v26 = vpop.f32.mrf.mxu1 }
  0xd0   : > { %1230 = vst [vmem:[%s1461_s21 + $0x48] sm:$0xff] %v1190_v20   ;;  %v590_v28 = vadd.f32 %v1451_v46, %v589_v21 }
  0xd1   : > { %v551_v23 = vpop.f32.mrf.mxu0 }
  0xd2   : > { %v552_v25 = vadd.f32 %v1451_v46, %v551_v23  ;;  %v679_v33 = vadd.f32 %v678_v62, %v590_v28 }
  0xd4   : > { %v641_v27 = vadd.f32 %v640_v61, %v552_v25  ;;  %v728_v39 = vmax.f32 %v679_v33, 0.0 }
  0xd6   : > { %v713_v30 = vmax.f32 %v641_v27, 0.0 }
  0xd7   : > { %v591_v32 = vpop.f32.mrf.mxu2  ;;  %v650_v36 = vpop.f32.mrf.mxu1 }
  0xd8   : > { %v1155_v31 = vpack.c.bf16 %v713_v30, %v712_v29  ;;  %v592_v34 = vadd.f32 %v1451_v46, %v591_v32 }
  0xd9   : > { %v554_v35 = vpop.f32.mrf.mxu0 }
  0xda   : > { %1223 = vst [vmem:[%s1461_s21 + $0x10] sm:$0xff] %v1155_v31   ;;  %v681_v38 = vadd.f32 %v680_v9, %v592_v34  ;;  %v555_v41 = vadd.f32 %v1451_v46, %v554_v35 }
  0xdc   : > { %v729_v40 = vmax.f32 %v681_v38, 0.0  ;;  %v644_v45 = vadd.f32 %v643_v4, %v555_v41 }
  0xde   : > { %v1195_v42 = vpack.c.bf16 %v729_v40, %v728_v39  ;;  %v714_v53 = vmax.f32 %v644_v45, 0.0 }
  0xdf   : > { %v594_v43 = vpop.f32.mrf.mxu2  ;;  %v653_v48 = vpop.f32.mrf.mxu1 }
  0xe0   : > { %1231 = vst [vmem:[%s1461_s21 + $0x50] sm:$0xff] %v1195_v42   ;;  %v595_v52 = vadd.f32 %v1451_v46, %v594_v43 }
  0xe1   : > { %v556_v44 = vpop.f32.mrf.mxu0 }
  0xe2   : > { %v557_v47 = vadd.f32 %v1451_v46, %v556_v44  ;;  %v684_v57 = vadd.f32 %v683_v22, %v595_v52 }
  0xe4   : > { %v646_v50 = vadd.f32 %v645_v15, %v557_v47  ;;  %v730_v63 = vmax.f32 %v684_v57, 0.0  ;;  %v693_v15 = vpop.f32.mrf.mxu3 }
  0xe6   : > { %v715_v54 = vmax.f32 %v646_v50, 0.0 }
  0xe7   : > { %v596_v56 = vpop.f32.mrf.mxu2  ;;  %v655_v61 = vpop.f32.mrf.mxu1 }
  0xe8   : > { %v1160_v55 = vpack.c.bf16 %v715_v54, %v714_v53  ;;  %v597_v58 = vadd.f32 %v1451_v46, %v596_v56 }
  0xe9   : > { %v559_v60 = vpop.f32.mrf.mxu0 }
  0xea   : > { %1224 = vst [vmem:[%s1461_s21 + $0x18] sm:$0xff] %v1160_v55   ;;  %v686_v62 = vadd.f32 %v685_v37, %v597_v58  ;;  %v560_v1 = vadd.f32 %v1451_v46, %v559_v60  ;;  %v580_v60 = vadd.f32 %v1451_v46, %v1454_v49 }
  0xec   : > { %v731_v0 = vmax.f32 %v686_v62, 0.0  ;;  %v649_v6 = vadd.f32 %v648_v26, %v560_v1  ;;  %v695_v30 = vpop.f32.mrf.mxu3 }
  0xee   : > { %v1200_v3 = vpack.c.bf16 %v731_v0, %v730_v63  ;;  %v716_v11 = vmax.f32 %v649_v6, 0.0  ;;  %v582_v63 = vadd.f32 %v1451_v46, %v1463_v59 }
  0xef   : > { %v599_v4 = vpop.f32.mrf.mxu2  ;;  %v658_v8 = vpop.f32.mrf.mxu1 }
  0xf0   : > { %1232 = vst [vmem:[%s1461_s21 + $0x58] sm:$0xff] %v1200_v3   ;;  %v600_v10 = vadd.f32 %v1451_v46, %v599_v4 }
  0xf1   : > { %v561_v5 = vpop.f32.mrf.mxu0 }
  0xf2   : > { %v562_v7 = vadd.f32 %v1451_v46, %v561_v5  ;;  %v689_v16 = vadd.f32 %v688_v51, %v600_v10 }
  0xf4   : > { %v651_v9 = vadd.f32 %v650_v36, %v562_v7  ;;  %v732_v21 = vmax.f32 %v689_v16, 0.0  ;;  %v698_v42 = vpop.f32.mrf.mxu3 }
  0xf6   : > { %v717_v12 = vmax.f32 %v651_v9, 0.0 }
  0xf7   : > { %v601_v14 = vpop.f32.mrf.mxu2  ;;  %v660_v19 = vpop.f32.mrf.mxu1 }
  0xf8   : > { %v1165_v13 = vpack.c.bf16 %v717_v12, %v716_v11  ;;  %v602_v17 = vadd.f32 %v1451_v46, %v601_v14 }
  0xf9   : > { %v564_v18 = vpop.f32.mrf.mxu0 }
  0xfa   : > { %1225 = vst [vmem:[%s1461_s21 + $0x20] sm:$0xff] %v1165_v13   ;;  %v691_v20 = vadd.f32 %v690_v2, %v602_v17  ;;  %v565_v23 = vadd.f32 %v1451_v46, %v564_v18 }
  0xfc   : > { %v733_v22 = vmax.f32 %v691_v20, 0.0  ;;  %v654_v27 = vadd.f32 %v653_v48, %v565_v23  ;;  %v700_v58 = vpop.f32.mrf.mxu3 }
  0xfe   : > { %v1205_v24 = vpack.c.bf16 %v733_v22, %v732_v21  ;;  %v718_v33 = vmax.f32 %v654_v27, 0.0 }
  0xff   : > { %v604_v25 = vpop.f32.mrf.mxu2  ;;  %v663_v29 = vpop.f32.mrf.mxu1 }
 0x100   : > { %1233 = vst [vmem:[%s1461_s21 + $0x60] sm:$0xff] %v1205_v24   ;;  %v605_v32 = vadd.f32 %v1451_v46, %v604_v25 }
 0x101   : > { %v566_v26 = vpop.f32.mrf.mxu0 }
 0x102   : > { %v567_v28 = vadd.f32 %v1451_v46, %v566_v26  ;;  %v694_v37 = vadd.f32 %v693_v15, %v605_v32 }
 0x104   : > { %v656_v31 = vadd.f32 %v655_v61, %v567_v28  ;;  %v734_v43 = vmax.f32 %v694_v37, 0.0  ;;  %v703_v59 = vpop.f32.mrf.mxu3 }
 0x106   : > { %v719_v34 = vmax.f32 %v656_v31, 0.0 }
 0x107   : > { %v606_v36 = vpop.f32.mrf.mxu2  ;;  %v665_v40 = vpop.f32.mrf.mxu1 }
 0x108   : > { %v1170_v35 = vpack.c.bf16 %v719_v34, %v718_v33  ;;  %v607_v38 = vadd.f32 %v1451_v46, %v606_v36 }
 0x109   : > { %v569_v39 = vpop.f32.mrf.mxu0 }
 0x10a   : > { %1226 = vst [vmem:[%s1461_s21 + $0x28] sm:$0xff] %v1170_v35   ;;  %v696_v41 = vadd.f32 %v695_v30, %v607_v38  ;;  %v570_v45 = vadd.f32 %v1451_v46, %v569_v39 }
 0x10c   : > { %v735_v44 = vmax.f32 %v696_v41, 0.0  ;;  %v659_v51 = vadd.f32 %v658_v8, %v570_v45  ;;  %v705_v25 = vpop.f32.mrf.mxu3 }
 0x10e   : > { %v1210_v47 = vpack.c.bf16 %v735_v44, %v734_v43  ;;  %v720_v56 = vmax.f32 %v659_v51, 0.0 }
 0x10f   : > { %v609_v48 = vpop.f32.mrf.mxu2  ;;  %v668_v53 = vpop.f32.mrf.mxu1 }
 0x110   : > { %1234 = vst [vmem:[%s1461_s21 + $0x68] sm:$0xff] %v1210_v47   ;;  %v610_v55 = vadd.f32 %v1451_v46, %v609_v48  ;;  %v669_v1 = vadd.f32 %v668_v53, %v580_v60 }
 0x111   : > { %v571_v50 = vpop.f32.mrf.mxu0 }
 0x112   : > { %v572_v52 = vadd.f32 %v1451_v46, %v571_v50  ;;  %v699_v0 = vadd.f32 %v698_v42, %v610_v55  ;;  %v724_v8 = vmax.f32 %v669_v1, 0.0 }
 0x114   : > { %v661_v54 = vadd.f32 %v660_v19, %v572_v52  ;;  %v736_v7 = vmax.f32 %v699_v0, 0.0 }
 0x116   : > { %v721_v57 = vmax.f32 %v661_v54, 0.0 }
 0x117   : > { %v611_v62 = vpop.f32.mrf.mxu2  ;;  %v670_v4 = vpop.f32.mrf.mxu1 }
 0x118   : > { %v1175_v61 = vpack.c.bf16 %v721_v57, %v720_v56  ;;  %v612_v2 = vadd.f32 %v1451_v46, %v611_v62  ;;  %v671_v6 = vadd.f32 %v670_v4, %v582_v63 }
 0x119   : > { %v574_v3 = vpop.f32.mrf.mxu0 }
 0x11a   : > { %1227 = vst [vmem:[%s1461_s21 + $0x30] sm:$0xff] %v1175_v61   ;;  %v701_v5 = vadd.f32 %v700_v58, %v612_v2  ;;  %v725_v49 = vmax.f32 %v671_v6, 0.0  ;;  %v575_v10 = vadd.f32 %v1451_v46, %v574_v3 }
 0x11c   : > { %v737_v9 = vmax.f32 %v701_v5, 0.0  ;;  %v1185_v12 = vpack.c.bf16 %v725_v49, %v724_v8  ;;  %v664_v15 = vadd.f32 %v663_v29, %v575_v10 }
 0x11e   : > { %v1215_v11 = vpack.c.bf16 %v737_v9, %v736_v7  ;;  %1229 = vst [vmem:[%s1461_s21 + $0x40] sm:$0xff] %v1185_v12   ;;  %v722_v19 = vmax.f32 %v664_v15, 0.0 }
 0x11f   : > { %v614_v13 = vpop.f32.mrf.mxu2 }
 0x120   : > { %1235 = vst [vmem:[%s1461_s21 + $0x70] sm:$0xff] %v1215_v11   ;;  %v615_v18 = vadd.f32 %v1451_v46, %v614_v13 }
 0x121   : > { %v576_v14 = vpop.f32.mrf.mxu0 }
 0x122   : > { %v577_v16 = vadd.f32 %v1451_v46, %v576_v14  ;;  %v704_v23 = vadd.f32 %v703_v59, %v615_v18 }
 0x124   : > { %v666_v17 = vadd.f32 %v665_v40, %v577_v16  ;;  %v738_v27 = vmax.f32 %v704_v23, 0.0 }
 0x126   : > { %v723_v20 = vmax.f32 %v666_v17, 0.0 }
 0x127   : > { %v616_v22 = vpop.f32.mrf.mxu2 }
 0x128   : > { %v1180_v21 = vpack.c.bf16 %v723_v20, %v722_v19  ;;  %v617_v24 = vadd.f32 %v1451_v46, %v616_v22 }
 0x12a   : > { %1228 = vst [vmem:[%s1461_s21 + $0x38] sm:$0xff] %v1180_v21   ;;  %v706_v26 = vadd.f32 %v705_v25, %v617_v24 }
 0x12c   : > { %v739_v28 = vmax.f32 %v706_v26, 0.0 }
 0x12e   : > { %v1220_v29 = vpack.c.bf16 %v739_v28, %v738_v27 }
 0x130   : > { %1236 = vst [vmem:[%s1461_s21 + $0x78] sm:$0xff] %v1220_v29  }
 0x131 PF: > { %s13_s14 = sadd.s32 1, %s1293_s14   ;;  %s1526_s12 = smov %s1289_s13 }
 0x132   : > { %p10_p5 = scmp.ge.s32.totalorder %s13_s14, 4   ;;  %s1527_s13 = smov %s1529_s15 }
 0x134   :  { %12 = sbr.rel (!%p10_p5) target bundleno = 2 (0x2), region = 68 }

</bundles_post_ra>
